<compile_context>
chip_gen: v6e
topology: v6e:2x2x1
jax: 0.10.0
libtpu: 0.0.40
codegen_flags: <defaults>
</compile_context>

<pallas_src>
import functools

import jax
import jax.numpy as jnp
from jax.experimental import pallas as pl
from jax.experimental.pallas import tpu as pltpu


def _statics_pool_kernel(x_ref, o_ref, mean_acc, m2_acc, *, T, TK):
    k = pl.program_id(2)
    nk = pl.num_programs(2)

    def combine(mean_b, m2_b, n_b):
        @pl.when(k == 0)
        def _():
            mean_acc[...] = mean_b
            m2_acc[...] = m2_b

        @pl.when(k > 0)
        def _():
            # Chan parallel combine: all previous tiles are full, so n_a = k*TK.
            n_a = (k * TK).astype(jnp.float32)
            n_ab = n_a + n_b
            delta = mean_b - mean_acc[...]
            mean_acc[...] = mean_acc[...] + delta * (n_b / n_ab)
            m2_acc[...] = m2_acc[...] + m2_b + (delta * delta) * (n_a * n_b / n_ab)

    def full_tile():
        # Unmasked fast path: two-pass (mean / M2) statistics over the tile.
        x = x_ref[...].astype(jnp.float32)               # (BBLK, TK, DBLK)
        mean_b = jnp.sum(x, axis=1) * jnp.float32(1.0 / TK)
        diff = x - mean_b[:, None, :]
        m2_b = jnp.sum(diff * diff, axis=1)
        combine(mean_b, m2_b, jnp.float32(TK))

    rem = T % TK  # static Python int
    if rem != 0:
        # Only the statically-last T tile is partial: mask only there.
        @pl.when(k < nk - 1)
        def _():
            full_tile()

        @pl.when(k == nk - 1)
        def _():
            x = x_ref[...].astype(jnp.float32)
            t_idx = jax.lax.broadcasted_iota(jnp.int32, x.shape, 1)
            valid = t_idx < rem                          # static bound
            n_b = jnp.float32(rem)
            x = jnp.where(valid, x, 0.0)
            mean_b = jnp.sum(x, axis=1) / n_b
            diff = jnp.where(valid, x - mean_b[:, None, :], 0.0)
            m2_b = jnp.sum(diff * diff, axis=1)
            combine(mean_b, m2_b, n_b)
    else:
        full_tile()

    @pl.when(k == nk - 1)
    def _():
        mean = mean_acc[...]
        # Unbiased variance (torch.std default, correction=1).
        std = jnp.sqrt(m2_acc[...] / jnp.float32(T - 1))
        # Lane-dense, unmasked stores: both slices start at lane offset 0.
        o_ref[:, 0, :] = mean.astype(o_ref.dtype)
        o_ref[:, 1, :] = std.astype(o_ref.dtype)


def statics_pooling(inputs, *, tk=None, bblk=None, vmem_limit_bytes=None):
    """inputs: (B, T, D) -> (B, 2*D), matching StaticsPooling.forward."""
    B, T, D = inputs.shape
    itemsize = jnp.dtype(inputs.dtype).itemsize
    # Packed-sublane multiple for the block's second-to-last (time) dim.
    sub = max(8, 32 // itemsize)          # f32 -> 8, bf16 -> 16, int8/fp8 -> 32

    # Batch rows per grid step: 8 for sublane-friendly blocks when possible,
    # otherwise the full (small) batch so the block equals the array dim.
    if bblk is None:
        bblk = 8 if B >= 8 else B
    nb = -(-B // bblk)

    # Feature split: with a single batch block, shard D across v7x's two TCs
    # (harmless extra "parallel" axis of size 1-2 on v5e/v6e).
    if nb == 1 and D % 256 == 0:
        nd, dblk = 2, D // 2
    else:
        nd, dblk = 1, D

    # Chip-aware VMEM budget: ~70% of physical capacity, clamped to [32, 96] MiB.
    if vmem_limit_bytes is None:
        try:
            vmem_cap = int(pltpu.get_tpu_info().vmem_capacity_bytes)
        except Exception:
            vmem_cap = 64 * 1024 * 1024   # conservative (v7x-sized) fallback
        vmem_limit_bytes = max(32 * 1024 * 1024,
                               min(int(0.70 * vmem_cap), 96 * 1024 * 1024))

    # Time-tile size: budget = double-buffered input + ~2 full-tile f32
    # temporaries (upcast + diff) + output block + scratch, with 25% headroom.
    if tk is None:
        budget = int(0.75 * vmem_limit_bytes)
        fixed = 2 * bblk * 2 * dblk * itemsize + 2 * bblk * dblk * 4
        per_t = bblk * dblk * (2 * itemsize + 8)
        tk_max = max(sub, (budget - fixed) // max(1, per_t))
        if tk_max >= T:
            tk = T                        # single reduction step (full extent)
        else:
            # Balance the tiles so the last one is not a tiny ragged step.
            nk = -(-T // tk_max)
            tk = -(-T // nk)
            tk = ((tk + sub - 1) // sub) * sub
            tk = min(tk, T)
    else:
        tk = int(tk)
        if tk < T:
            tk = min(T, max(sub, ((tk + sub - 1) // sub) * sub))
        else:
            tk = T

    grid = (nb, nd, -(-T // tk))
    kernel = functools.partial(_statics_pool_kernel, T=T, TK=tk)

    out = pl.pallas_call(
        kernel,
        out_shape=jax.ShapeDtypeStruct((B, 2, D), inputs.dtype),
        grid_spec=pltpu.PrefetchScalarGridSpec(
            num_scalar_prefetch=0,
            grid=grid,
            in_specs=[pl.BlockSpec((bblk, tk, dblk),
                                   lambda bi, di, ki: (bi, ki, di))],
            out_specs=pl.BlockSpec((bblk, 2, dblk),
                                   lambda bi, di, ki: (bi, 0, di)),
            scratch_shapes=[
                pltpu.VMEM((bblk, dblk), jnp.float32),   # running mean
                pltpu.VMEM((bblk, dblk), jnp.float32),   # running M2
            ],
        ),
        compiler_params=pltpu.CompilerParams(
            dimension_semantics=("parallel", "parallel", "arbitrary"),
            vmem_limit_bytes=int(vmem_limit_bytes),
        ),
    )(inputs)
    # (B, 2, D) -> (B, 2*D): contiguous reshape, matches torch.cat((mean, std), 1).
    return out.reshape(B, 2 * D)


def _reference(inputs):
    mean = jnp.mean(inputs, axis=1)
    std = jnp.std(inputs, axis=1, ddof=1)  # unbiased, like torch.std default
    return jnp.concatenate([mean, std], axis=1)


if __name__ == "__main__":
    key = jax.random.PRNGKey(0)
    k1, k2, k3, k4 = jax.random.split(key, 4)

    # Case 1: multi-tile reduction over T (exact division, unmasked fast path).
    x1 = jax.random.normal(k1, (2, 24, 32), dtype=jnp.float32)
    out1 = statics_pooling(x1, tk=8)

    # Case 2: partial final T tile (T % TK != 0) exercises the last-tile-only
    # mask path, with a mean offset to exercise the Chan combine numerics.
    x2 = jax.random.normal(k2, (2, 20, 32), dtype=jnp.float32) + 3.0
    out2 = statics_pooling(x2, tk=8)

    # Case 3: automatic tile selection (single T tile at these shapes).
    x3 = jax.random.normal(k3, (4, 16, 32), dtype=jnp.float32)
    out3 = statics_pooling(x3)

    # Case 4: D % 256 == 0 with a single batch block -> feature-split grid axis
    # (two parallel D blocks) and lane-dense split stores.
    x4 = jax.random.normal(k4, (2, 16, 256), dtype=jnp.float32) - 1.5
    out4 = statics_pooling(x4)

    jax.block_until_ready((out1, out2, out3, out4))

    for x, out in ((x1, out1), (x2, out2), (x3, out3), (x4, out4)):
        ref = _reference(x)
        assert out.shape == ref.shape, (out.shape, ref.shape)
        err = float(jnp.max(jnp.abs(out - ref)))
        assert jnp.allclose(out, ref, atol=1e-5, rtol=1e-5), err

    print("KERNEL_OK")
</pallas_src>

<mosaic_0001>
module attributes {stable_mosaic.version = 11 : i64} {
  func.func @_statics_pool_kernel(%arg0: i32, %arg1: i32, %arg2: i32, %arg3: memref<2x8x32xf32, #tpu.memory_space<vmem>>, %arg4: memref<2x2x32xf32, #tpu.memory_space<vmem>>, %arg5: memref<2x32xf32, #tpu.memory_space<vmem>>, %arg6: memref<2x32xf32, #tpu.memory_space<vmem>>) attributes {dimension_semantics = [#tpu.dimension_semantics<parallel>, #tpu.dimension_semantics<parallel>, #tpu.dimension_semantics<arbitrary>], iteration_bounds = array<i64: 1, 1, 3>, scalar_prefetch = 0 : i64, scratch_operands = 2 : i64, tpu.core_type = #tpu.core_type<tc>, window_params = [{transform_indices = @transform_0, window_bounds = array<i64: 2, 8, 32>}, {transform_indices = @transform_1, window_bounds = array<i64: 2, 2, 32>}]} {
    %c0 = arith.constant 0 : index
    %c0_0 = arith.constant 0 : index
    %c0_1 = arith.constant 0 : index
    %0 = vector.load %arg3[%c0, %c0_0, %c0_1] : memref<2x8x32xf32, #tpu.memory_space<vmem>>, vector<2x8x32xf32>
    %cst = arith.constant dense<0.000000e+00> : vector<2x32xf32>
    %1 = vector.multi_reduction <add>, %0, %cst [1] : vector<2x8x32xf32> to vector<2x32xf32>
    %cst_2 = arith.constant 1.250000e-01 : f32
    %2 = vector.broadcast %cst_2 : f32 to vector<2x32xf32>
    %3 = arith.mulf %1, %2 : vector<2x32xf32>
    %4 = vector.shape_cast %3 : vector<2x32xf32> to vector<2x1x32xf32>
    %5 = vector.broadcast %4 : vector<2x1x32xf32> to vector<2x8x32xf32>
    %6 = arith.subf %0, %5 : vector<2x8x32xf32>
    %7 = arith.mulf %6, %6 : vector<2x8x32xf32>
    %cst_3 = arith.constant dense<0.000000e+00> : vector<2x32xf32>
    %8 = vector.multi_reduction <add>, %7, %cst_3 [1] : vector<2x8x32xf32> to vector<2x32xf32>
    %c0_i32 = arith.constant 0 : i32
    %9 = arith.cmpi eq, %arg2, %c0_i32 : i32
    %10 = arith.extui %9 : i1 to i32
    %c0_i32_4 = arith.constant 0 : i32
    %11 = arith.cmpi ne, %10, %c0_i32_4 : i32
    scf.if %11 {
      %c0_9 = arith.constant 0 : index
      %c0_10 = arith.constant 0 : index
      %18 = vector.load %arg5[%c0_9, %c0_10] : memref<2x32xf32, #tpu.memory_space<vmem>>, vector<2x32xf32>
      tpu.vector_store %arg5[%c0_9, %c0_10], %3 {strides = array<i32>} : memref<2x32xf32, #tpu.memory_space<vmem>>, vector<2x32xf32>,
      %c0_11 = arith.constant 0 : index
      %c0_12 = arith.constant 0 : index
      %19 = vector.load %arg6[%c0_11, %c0_12] : memref<2x32xf32, #tpu.memory_space<vmem>>, vector<2x32xf32>
      tpu.vector_store %arg6[%c0_11, %c0_12], %8 {strides = array<i32>} : memref<2x32xf32, #tpu.memory_space<vmem>>, vector<2x32xf32>,
    } else {
    }
    %c0_i32_5 = arith.constant 0 : i32
    %12 = arith.cmpi sgt, %arg2, %c0_i32_5 : i32
    %13 = arith.extui %12 : i1 to i32
    %cst_6 = arith.constant 8.000000e+00 : f32
    %c0_i32_7 = arith.constant 0 : i32
    %14 = arith.cmpi ne, %13, %c0_i32_7 : i32
    scf.if %14 {
      %c8_i32 = arith.constant 8 : i32
      %18 = arith.muli %arg2, %c8_i32 : i32
      %19 = arith.sitofp %18 : i32 to f32
      %20 = arith.addf %19, %cst_6 : f32
      %c0_9 = arith.constant 0 : index
      %c0_10 = arith.constant 0 : index
      %21 = vector.load %arg5[%c0_9, %c0_10] : memref<2x32xf32, #tpu.memory_space<vmem>>, vector<2x32xf32>
      %22 = arith.subf %3, %21 : vector<2x32xf32>
      %c0_11 = arith.constant 0 : index
      %c0_12 = arith.constant 0 : index
      %23 = vector.load %arg5[%c0_11, %c0_12] : memref<2x32xf32, #tpu.memory_space<vmem>>, vector<2x32xf32>
      %24 = arith.divf %cst_6, %20 : f32
      %25 = vector.broadcast %24 : f32 to vector<2x32xf32>
      %26 = arith.mulf %22, %25 : vector<2x32xf32>
      %27 = arith.addf %23, %26 : vector<2x32xf32>
      %c0_13 = arith.constant 0 : index
      %c0_14 = arith.constant 0 : index
      %28 = vector.load %arg5[%c0_13, %c0_14] : memref<2x32xf32, #tpu.memory_space<vmem>>, vector<2x32xf32>
      tpu.vector_store %arg5[%c0_13, %c0_14], %27 {strides = array<i32>} : memref<2x32xf32, #tpu.memory_space<vmem>>, vector<2x32xf32>,
      %c0_15 = arith.constant 0 : index
      %c0_16 = arith.constant 0 : index
      %29 = vector.load %arg6[%c0_15, %c0_16] : memref<2x32xf32, #tpu.memory_space<vmem>>, vector<2x32xf32>
      %30 = arith.addf %29, %8 : vector<2x32xf32>
      %31 = arith.mulf %22, %22 : vector<2x32xf32>
      %32 = arith.mulf %19, %cst_6 : f32
      %33 = arith.divf %32, %20 : f32
      %34 = vector.broadcast %33 : f32 to vector<2x32xf32>
      %35 = arith.mulf %31, %34 : vector<2x32xf32>
      %36 = arith.addf %30, %35 : vector<2x32xf32>
      %c0_17 = arith.constant 0 : index
      %c0_18 = arith.constant 0 : index
      %37 = vector.load %arg6[%c0_17, %c0_18] : memref<2x32xf32, #tpu.memory_space<vmem>>, vector<2x32xf32>
      tpu.vector_store %arg6[%c0_17, %c0_18], %36 {strides = array<i32>} : memref<2x32xf32, #tpu.memory_space<vmem>>, vector<2x32xf32>,
    } else {
    }
    %c2_i32 = arith.constant 2 : i32
    %15 = arith.cmpi eq, %arg2, %c2_i32 : i32
    %16 = arith.extui %15 : i1 to i32
    %c0_i32_8 = arith.constant 0 : i32
    %17 = arith.cmpi ne, %16, %c0_i32_8 : i32
    scf.if %17 {
      %c0_9 = arith.constant 0 : index
      %c0_10 = arith.constant 0 : index
      %18 = vector.load %arg5[%c0_9, %c0_10] : memref<2x32xf32, #tpu.memory_space<vmem>>, vector<2x32xf32>
      %c0_11 = arith.constant 0 : index
      %c0_12 = arith.constant 0 : index
      %19 = vector.load %arg6[%c0_11, %c0_12] : memref<2x32xf32, #tpu.memory_space<vmem>>, vector<2x32xf32>
      %cst_13 = arith.constant 2.300000e+01 : f32
      %20 = vector.broadcast %cst_13 : f32 to vector<2x32xf32>
      %21 = arith.divf %19, %20 : vector<2x32xf32>
      %22 = math.sqrt %21 : vector<2x32xf32>
      %c0_14 = arith.constant 0 : index
      %c0_15 = arith.constant 0 : index
      %c0_16 = arith.constant 0 : index
      %23 = vector.load %arg4[%c0_14, %c0_15, %c0_16] : memref<2x2x32xf32, #tpu.memory_space<vmem>>, vector<2x1x32xf32>
      %24 = vector.shape_cast %23 : vector<2x1x32xf32> to vector<2x32xf32>
      %25 = vector.shape_cast %18 : vector<2x32xf32> to vector<2x1x32xf32>
      tpu.vector_store %arg4[%c0_14, %c0_15, %c0_16], %25 {strides = array<i32>} : memref<2x2x32xf32, #tpu.memory_space<vmem>>, vector<2x1x32xf32>,
      %c0_17 = arith.constant 0 : index
      %c1 = arith.constant 1 : index
      %c0_18 = arith.constant 0 : index
      %26 = vector.load %arg4[%c0_17, %c1, %c0_18] : memref<2x2x32xf32, #tpu.memory_space<vmem>>, vector<2x1x32xf32>
      %27 = vector.shape_cast %26 : vector<2x1x32xf32> to vector<2x32xf32>
      %28 = vector.shape_cast %22 : vector<2x32xf32> to vector<2x1x32xf32>
      tpu.vector_store %arg4[%c0_17, %c1, %c0_18], %28 {strides = array<i32>} : memref<2x2x32xf32, #tpu.memory_space<vmem>>, vector<2x1x32xf32>,
    } else {
    }
    return
  }
  func.func @transform_0(%arg0: i32, %arg1: i32, %arg2: i32) -> (i32, i32, i32) {
    %c0_i32 = arith.constant 0 : i32
    return %arg0, %arg2, %arg1 : i32, i32, i32
  }
  func.func @transform_1(%arg0: i32, %arg1: i32, %arg2: i32) -> (i32, i32, i32) {
    %c0_i32 = arith.constant 0 : i32
    %c0_i32_0 = arith.constant 0 : i32
    return %arg0, %c0_i32, %arg1 : i32, i32, i32
  }
}

</mosaic_0001>

<bundles_post_ra>
// kernel: tpu_custom_call.1
= control target key start
LH: loop header
LB: loop body
LE: loop exit
PB: predicated region body
PF: predicated region fallthrough
CT: control target
= control target key end

     0   :  { %6 = vsyncpa [#allocation5], 0  ;;  %s759_s0 = inlined_call_operand.hbm [shape: f32[2,24,32], index: 0, kind: input, shape index: {}]   ;;  %s760_s1 = inlined_call_operand.hbm [shape: f32[2,2,32], index: 1, kind: output, shape index: {}]  }
   0x1   :  { %8 = vsyncpa [#allocation5 + $0x1], 0 }
   0x2   :  { %9 = vsyncpa [#allocation6], 0  ;;  %s632_s6 = smov 0   ;;  %s634_s7 = smov 0  }
   0x3   :  { %s636_s8 = smov 0   ;;  %s638_s9 = smov 0  }
   0x4   :  { %s640_s10 = smov 0   ;;  %s642_s11 = smov 0  }
   0x5 LB: > { %s416_s12 = sadd.s32 4294967295, %s612_s11   ;;  %s27_s13 = sadd.s32 1, %s608_s10  ;;  %s612_s11 = sphi %s642_s11, %s15_s11   ;;  %s608_s10 = sphi %s640_s10, %s769_s10   ;;  %s604_s9 = sphi %s638_s9, %s768_s9   ;;  %s600_s8 = sphi %s636_s8, %s767_s8   ;;  %s596_s7 = sphi %s634_s7, %s766_s7   ;;  %s592_s6 = sphi %s632_s6, %s765_s6  }
   0x6   : > { %p28_p0 = scmp.ge.s32.totalorder %s27_s13, 3  ;;  %s45_s14 = sadd.s32 1, %s600_s8 }
   0x7   : > { %p52_p1 = scmp.ne.s32.totalorder %s600_s8, %s596_s7  ;;  %p53_p2 = scmp.eq.s32.totalorder %s612_s11, 0 }
   0x8   : > { %s771_s13 = smov (%p28_p0, %s27_s13), 0  ;;  %p58_p4 = scmp.ne.s32.totalorder %s596_s7, %s592_s6 }
   0x9   : > { %p668_p3 = por %p53_p2, %p52_p1  ;;  %s39_s16 = ssub.s32 %s608_s10, %s771_s13 }
   0xa   : > { %p59_p5 = scmp.eq.s32.totalorder %s416_s12, 0  ;;  %p43_p6 = scmp.eq.s32.totalorder %s39_s16, 0 }
   0xb   : > { %p444_p8 = scmp.lt.s32.totalorder %s612_s11, 3  ;;  %s110_s19 = sand.u32 1, %s600_s8  }
   0xc   : > { %p677_p7 = por %p59_p5, %p58_p4  ;;  %s420_s20 = sshll.u32 %s608_s10, 7 }
   0xd   : > { %s683_s18 = scalar_select %p43_p6, %s600_s8, %s45_s14  }
   0xe   : > { %s419_s21 = sshll.u32 %s110_s19, 4  ;;  %s123_s24 = scalar_lea.hbm %s759_s0, %s420_s20 }
   0xf   : > { %s114_s25 = scalar_lea.vmem [#allocation4], %s419_s21  ;;  %p692_p9 = pnand %p444_p8, %p668_p3 }
  0x10   : > { %s124_s26 = sshll.u32 %s114_s25, 4  ;;  %p421_p10 = scmp.ge.s32.totalorder %s612_s11, 1  ;;  %s125_s26 = int_to_ptr.vmem [resolvable:$true] %s124_s26 }
  0x11   : > { %s111_s28 = scalar_lea.sflag [#allocation5], %s110_s19  ;;  %p508_p11 = pneg %p692_p9 }
  0x12   : > { %s519_s29 = scalar_lea.vmem %s125_s26, 256  ;;  %s614_s30 = smov [#allocation4]  }
  0x13   : > { %p520_p12 = scmp.ne.s32.totalorder %s125_s26, %s519_s29  ;;  %s524_s2 = sshll.u32 %s614_s30, 4  ;;  %s525_s2 = int_to_ptr.vmem [resolvable:$false] %s524_s2 }
  0x14   : > { %s526_s3 = scalar_lea.vmem %s525_s2, 512  ;;  %p527_p1 = scmp.lt.s32.totalorder %s125_s26, %s525_s2 }
  0x15   : > { %p522_p13 = pnand %p520_p12, %p508_p11  ;;  %p528_p2 = scmp.lt.s32.totalorder %s526_s3, %s519_s29 }
  0x17   : > { %p523_p0 = pneg %p522_p13  ;;  %p529_p3 = por %p528_p2, %p527_p1 }
  0x19   : > { %p530_p4 = pnand %p529_p3, %p523_p0 }
  0x1b   : > { %533 = shalt.err (!%p530_p4)
}
  0x1c   : > { %s615_s4 = smov 384   ;;  %s616_s5 = smov 128  }
  0x1d   : > { %s617_s6 = smov 8   ;;  %p132_p5 = scmp.lt.s32.totalorder %s612_s11, 4 }
  0x1e   : > { %443 = dma.hbm_to_vmem [thread:$0]  (!%p692_p9), %s123_s24, 256, %s125_s26, %s111_s28, %s615_s4, %s616_s5, %s617_s6  }
  0x1f   : > { %p133_p6 = pnand %p421_p10, %p132_p5 }
  0x20   : > { %s138_s14 = sand.u32 (!%p133_p6), 1, %s596_s7  }
  0x21   : > { %136 = sbr.rel (%p133_p6) target bundleno = 210 (0xd2), region = 24  ;;  %s422_s15 = sshll.u32 (!%p133_p6), %s138_s14, 4 }
  0x22   : > { %s139_s16 = scalar_lea.sflag (!%p133_p6), [#allocation5], %s138_s14  ;;  %s142_s19 = scalar_lea.vmem (!%p133_p6), [#allocation4], %s422_s15 }
  0x26   : > { %583 = dma.done.wait (%p677_p7), %s139_s16, 256  }
  0x27   : > { %585 = vsyncadd (%p677_p7), %s139_s16, 4294967040  ;;  %vm160_vm0 = vcmask 261120   ;;  %v158_v0 = vld [vmem:[%s142_s19] sm:$0xff]  ;;  %v159_v1 = vld [vmem:[%s142_s19 + $0x8] sm:$0xff]  ;;  %p423_p7 = scmp.ne.s32.totalorder %s604_s9, 0 }
  0x28   : > { %v161_v2 = vsel %vm160_vm0, %v158_v0, 0.0  ;;  %v168_v3 = vsel %vm160_vm0, %v159_v1, 0.0 }
  0x29   : > { %v162_v4 = vrot.slane %v161_v2, 4  ;;  %v169_v5 = vrot.slane %v168_v3, 4 }
  0x2b   : > { %v163_v6 = vadd.f32 %v162_v4, %v161_v2  ;;  %v170_v7 = vadd.f32 %v169_v5, %v168_v3 }
  0x2d   : > { %v164_v8 = vrot.slane %v163_v6, 2  ;;  %v171_v9 = vrot.slane %v170_v7, 2 }
  0x2f   : > { %v165_v10 = vadd.f32 %v164_v8, %v163_v6  ;;  %v172_v11 = vadd.f32 %v171_v9, %v170_v7 }
  0x31   : > { %v166_v12 = vrot.slane %v165_v10, 1  ;;  %v173_v13 = vrot.slane %v172_v11, 1 }
  0x33   : > { %v167_v14 = vadd.f32 %v166_v12, %v165_v10  ;;  %v174_v15 = vadd.f32 %v173_v13, %v172_v11 }
  0x35   : > { %v175_v16 = vmul.f32 0.125, %v167_v14  ;;  %v176_v17 = vmul.f32 0.125, %v174_v15 }
  0x37   : > { %v177_v18 = vsub.f32 %v158_v0, %v175_v16  ;;  %v178_v19 = vsub.f32 %v159_v1, %v176_v17 }
  0x39   : > { %v179_v20 = vmul.f32 %v177_v18, %v177_v18  ;;  %v180_v21 = vmul.f32 %v178_v19, %v178_v19 }
  0x3b   : > { %v181_v22 = vsel %vm160_vm0, %v179_v20, 0.0  ;;  %v188_v23 = vsel %vm160_vm0, %v180_v21, 0.0 }
  0x3c   : > { %v182_v24 = vrot.slane %v181_v22, 4  ;;  %v189_v25 = vrot.slane %v188_v23, 4 }
  0x3e   : > { %v183_v26 = vadd.f32 %v182_v24, %v181_v22  ;;  %v190_v27 = vadd.f32 %v189_v25, %v188_v23 }
  0x40   : > { %v184_v28 = vrot.slane %v183_v26, 2  ;;  %v191_v29 = vrot.slane %v190_v27, 2 }
  0x42   : > { %v185_v30 = vadd.f32 %v184_v28, %v183_v26  ;;  %v192_v31 = vadd.f32 %v191_v29, %v190_v27  ;;  %198 = sbr.rel (%p423_p7) target bundleno = 74 (0x4a), region = 32 }
  0x44   : > { %v186_v32 = vrot.slane %v185_v30, 1  ;;  %v193_v33 = vrot.slane %v192_v31, 1 }
  0x46   : > { %v187_v34 = vadd.f32 %v186_v32, %v185_v30  ;;  %v194_v35 = vadd.f32 %v193_v33, %v192_v31 }
  0x47   : > { %vm201_vm1 = vcmask 1041409   ;;  %vm204_vm2 = vcmask 254976  }
  0x48   : > { %v202_v36 = vsel %vm201_vm1, %v176_v17, %v175_v16  ;;  %v208_v37 = vsel %vm201_vm1, %v194_v35, %v187_v34 }
  0x49   : > { %205 = vst.msk [vmem:[#allocation2] sm:$0x3] %vm204_vm2, %v202_v36  ;;  %210 = vst.msk [vmem:[#allocation3] sm:$0x3] %vm204_vm2, %v208_v37 }
  0x4a PF: > { %p424_p8 = scmp.le.s32.totalorder %s604_s9, 0 }
  0x4b   : > { %s425_s17 = sshll.u32 (!%p424_p8), %s604_s9, 3 }
  0x4c   : > { %214 = sbr.rel (%p424_p8) target bundleno = 158 (0x9e), region = 36  ;;  %s216_s20 = scvt.s32.f32 (!%p424_p8), %s425_s17 }
  0x4e   : > { %s217_s21 = sadd.f32 (!%p424_p8), 8.0, %s216_s20  ;;  %s249_s22 = smul.f32 (!%p424_p8), 8.0, %s216_s20 }
  0x51   : > { %v225_v38 = vstv %s217_s21  ;;  %v218_v40 = vld [vmem:[#allocation2] sm:$0x3]  ;;  %vm235_vm3 = vcmask 1041409   ;;  %v241_v46 = vld [vmem:[#allocation3] sm:$0x3]  ;;  %vm239_vm4 = vcmask 254976  }
  0x52   : > { %502 = vrcp.f32 %v225_v38  ;;  %v220_v41 = vrot.slane %v218_v40, 1  ;;  %v223_v43 = vsub.f32 %v175_v16, %v218_v40  ;;  %v244_v47 = vsel %vm235_vm3, %v194_v35, %v187_v34 }
  0x53   : > { %v246_v54 = vadd.f32 %v244_v47, %v241_v46 }
  0x54   : > { %v224_v42 = vsub.f32 %v176_v17, %v220_v41  ;;  %v247_v48 = vmul.f32 %v223_v43, %v223_v43 }
  0x56   : > { %v248_v44 = vmul.f32 %v224_v42, %v224_v42 }
  0x5f   : > { %v503_v39 = vpop.eup %502 }
  0x60   : > { %432 = vpush %v503_v39 }
  0x91   : > { %s433_s23 = spop %432 }
  0x92   : > { %s228_s24 = smul.f32 8.0, %s433_s23 }
  0x93   : > { %s253_s25 = smul.f32 %s433_s23, %s249_s22 }
  0x94   : > { %v229_v45 = vstv %s228_s24 }
  0x95   : > { %v231_v49 = vmul.f32 %v229_v45, %v224_v42  ;;  %v254_v50 = vstv %s253_s25  ;;  %v230_v52 = vmul.f32 %v229_v45, %v223_v43 }
  0x96   : > { %v256_v51 = vmul.f32 %v254_v50, %v248_v44  ;;  %v255_v55 = vmul.f32 %v254_v50, %v247_v48 }
  0x97   : > { %v234_v53 = vrot.slane %v231_v49, 7 }
  0x98   : > { %v259_v56 = vrot.slane %v256_v51, 7 }
  0x99   : > { %v236_v57 = vsel %vm235_vm3, %v234_v53, %v230_v52 }
  0x9a   : > { %v238_v58 = vadd.f32 %v236_v57, %v218_v40  ;;  %v260_v59 = vsel %vm235_vm3, %v259_v56, %v255_v55 }
  0x9b   : > { %v262_v60 = vadd.f32 %v260_v59, %v246_v54 }
  0x9c   : > { %240 = vst.msk [vmem:[#allocation2] sm:$0x3] %vm239_vm4, %v238_v58 }
  0x9d   : > { %263 = vst.msk [vmem:[#allocation3] sm:$0x3] %vm239_vm4, %v262_v60 }
  0x9e PF: > { %p426_p9 = scmp.ne.s32.totalorder %s604_s9, 2 }
  0xa0   : > { %267 = sbr.rel (%p426_p9) target bundleno = 194 (0xc2), region = 40 }
  0xa5   : > { %v427_v61 = vld.sshfl [vmem:[#allocation2] sm:$0x11 pattern:$0x75316420]  ;;  %v291_v62 = vlaneseq  ;;  %v618_v63 = vmov 1966171168  }
  0xa6   : > { %v289_v0 = vunpack.c.l.s4 %v618_v63  ;;  %v269_v1 = vld [vmem:[#allocation3] sm:$0x3]  ;;  %v287_v5 = vcombine.high %v427_v61, %v427_v61  ;;  %vm304_vm5 = vcmask 253952  }
  0xa7   : > { %v292_v2 = vshrl.u32 %v291_v62, 7  ;;  %v271_v3 = vmul.f32 0.04347826, %v269_v1 }
  0xa8   : > { %v290_v4 = vunpack.c.0.s8 %v289_v0 }
  0xa9   : > { %504 = vrsqrt.f32 %v271_v3  ;;  %vm274_vm6 = vcmp.eq.f32.partialorder %v271_v3, inf  ;;  %v277_v10 = vand.u32 2147483648, %v271_v3  ;;  %vm276_vm7 = vcmp.eq.f32.partialorder %v271_v3, 0.0 }
  0xaa   : > { %v293_v6 = vsub.s32 %v290_v4, %v292_v2 }
  0xac   : > { %v294_v7 = vrot.slane %v427_v61, %v293_v6  ;;  %v301_v8 = vrot.slane %v287_v5, %v293_v6 }
  0xae   : > { %305 = vst.msk [vmem:[#allocation7] sm:$0x1] %vm304_vm5, %v294_v7  ;;  %306 = vst.msk [vmem:[#allocation7 + $0x2] sm:$0x1] %vm304_vm5, %v301_v8 }
  0xb6   : > { %v505_v9 = vpop.eup %504 }
  0xb7   : > { %v273_v11 = vmul.f32 %v505_v9, %v271_v3 }
  0xb9   : > { %v275_v12 = vsel %vm274_vm6, %v271_v3, %v273_v11 }
  0xba   : > { %v278_v13 = vsel %vm276_vm7, %v277_v10, %v275_v12 }
  0xbb   : > { %v314_v14 = vrot.slane %v278_v13, %v293_v6 }
  0xbd   : > { %v322_v15 = vrot.slane %v314_v14, %v293_v6  ;;  %v315_v16 = vcombine.high %v314_v14, %v314_v14 }
  0xbf   : > { %332 = vst.msk [vmem:[#allocation7 + $0x1] sm:$0x1] %vm304_vm5, %v322_v15  ;;  %v329_v17 = vrot.slane %v315_v16, %v293_v6 }
  0xc1   : > { %333 = vst.msk [vmem:[#allocation7 + $0x3] sm:$0x1] %vm304_vm5, %v329_v17 }
  0xc2 PF: > { %p726_p10 = scmp.eq.s32.totalorder %s416_s12, 2  ;;  %s619_s26 = smov [#allocation7]  }
  0xc3   : > { %s344_s27 = sshll.u32 %s619_s26, 4  ;;  %s345_s27 = int_to_ptr.vmem [resolvable:$true] %s344_s27 }
  0xc4   : > { %s534_s28 = scalar_lea.vmem %s345_s27, 64  ;;  %p541_p0 = scmp.lt.s32.totalorder %s345_s27, %s345_s27 }
  0xc5   : > { %p535_p11 = scmp.ne.s32.totalorder %s345_s27, %s534_s28  ;;  %p542_p1 = scmp.lt.s32.totalorder %s534_s28, %s534_s28 }
  0xc7   : > { %p536_p12 = pnand %p535_p11, %p726_p10  ;;  %p543_p2 = por %p542_p1, %p541_p0 }
  0xc9   : > { %p537_p13 = pneg %p536_p12 }
  0xcb   : > { %p544_p3 = pnand %p543_p2, %p537_p13 }
  0xcd   : > { %547 = shalt.err (!%p544_p3)
}
  0xce   : > { %s620_s29 = smov 32   ;;  %s621_s12 = smov 2  }
  0xcf   : > { %437 = dma.vmem_to_hbm [thread:$0]  (%p726_p10), %s345_s27, 64, %s760_s1, [#allocation6], %s620_s29, %s620_s29, %s621_s12  }
  0xd0   : > { %587 = dma.done.wait (%p726_p10), [#allocation6], 64  }
  0xd1   : > { %589 = vsyncadd (%p726_p10), [#allocation6], 4294967232 }
  0xd2 PF: > { %s15_s11 = sadd.s32 1, %s612_s11   ;;  %s765_s6 = smov %s596_s7 }
  0xd3   : > { %p12_p4 = scmp.ge.s32.totalorder %s15_s11, 5   ;;  %s766_s7 = smov %s600_s8 }
  0xd4   : > { %s767_s8 = smov %s683_s18  ;;  %s768_s9 = smov %s608_s10 }
  0xd5   : > { %s769_s10 = smov %s771_s13  ;;  %14 = sbr.rel (!%p12_p4) target bundleno = 5 (0x5), region = 74 }
  0xda   :  { %360 = vsyncpa [#allocation5], 1 }
  0xdb   :  { %362 = vsyncpa [#allocation5 + $0x1], 1 }
  0xdc   :  { %363 = vsyncpa [#allocation6], 1 }
  0xdd   :  { %365 = vsyncpa [#allocation6 + $0x1], 1 }

</bundles_post_ra>
